<compile_context>
chip_gen: v6e
topology: v6e:2x2x1
jax: 0.10.0
libtpu: 0.0.40
codegen_flags: <defaults>
</compile_context>

<pallas_src>
import jax
import jax.numpy as jnp
from jax import lax
from jax.experimental import pallas as pl
from jax.experimental.pallas import tpu as pltpu

K = 7            # conv kernel size (nn.Conv3d(2, 1, 7, padding=3))
PAD = K // 2     # same padding


def _make_kernel(C, c_tile, n_c, D, HW):
    """Build the grid-step kernel, specialised at trace time for n_c."""
    ragged = (n_c * c_tile != C)

    def _reduce(x_ref, c_idx):
        """Partial channel sum / max of the current (c_tile, D, HW) block."""
        x = x_ref[...].astype(jnp.float32)
        if ragged:
            # Last tile may read past C: mask invalid channels
            # (0 for the sum, -inf for the max).
            ch = c_idx * c_tile + lax.broadcasted_iota(jnp.int32, (c_tile, D, HW), 0)
            valid = ch < C
            psum = jnp.sum(jnp.where(valid, x, 0.0), axis=0)
            pmax = jnp.max(jnp.where(valid, x, -jnp.inf), axis=0)
        else:
            psum = jnp.sum(x, axis=0)
            pmax = jnp.max(x, axis=0)
        return psum, pmax            # each (D, HW) f32

    def _conv_sigmoid(m_ref, halo_ref, sum_val, max_val, o_ref):
        """Depth-halo build (once per n) + K chained MXU matmuls + sigmoid."""
        halo_ref[:PAD, :] = jnp.zeros((PAD, 2 * HW), jnp.float32)
        halo_ref[PAD + D:, :] = jnp.zeros((PAD, 2 * HW), jnp.float32)
        halo_ref[PAD:PAD + D, :HW] = sum_val
        halo_ref[PAD:PAD + D, HW:] = max_val

        acc = jnp.zeros((D, HW), jnp.float32)
        for kd in range(K):   # unrolled: no concatenated (D, K*2*HW) copy
            lhs = halo_ref[kd:kd + D, :].astype(jnp.bfloat16)
            rhs = m_ref[kd * 2 * HW:(kd + 1) * 2 * HW, :]
            acc = acc + jnp.dot(lhs, rhs, preferred_element_type=jnp.float32)
        o_ref[...] = jax.nn.sigmoid(acc).astype(o_ref.dtype)

    if n_c == 1:
        # Whole C in one block: no cross-step scratch, no pl.when branches.
        def kernel(x_ref, m_ref, o_ref, halo_ref):
            psum, pmax = _reduce(x_ref, 0)
            _conv_sigmoid(m_ref, halo_ref, psum, pmax, o_ref)
    else:
        # Multi-step C reduction: sublane-aligned (D, 2*HW) accumulator.
        def kernel(x_ref, m_ref, o_ref, acc_ref, halo_ref):
            c_idx = pl.program_id(1)
            psum, pmax = _reduce(x_ref, c_idx)

            @pl.when(c_idx == 0)
            def _init():
                acc_ref[:, :HW] = psum
                acc_ref[:, HW:] = pmax

            @pl.when(c_idx > 0)
            def _accumulate():
                acc_ref[:, :HW] = acc_ref[:, :HW] + psum
                acc_ref[:, HW:] = jnp.maximum(acc_ref[:, HW:], pmax)

            @pl.when(c_idx == n_c - 1)
            def _finalize():
                _conv_sigmoid(m_ref, halo_ref, acc_ref[:, :HW], acc_ref[:, HW:],
                              o_ref)

    return kernel


def _build_im2col_weights(weight, C, H, W):
    """(1, 2, K, K, K) conv weights -> (K*2*H*W, H*W) im2col matrix.

    m[kd*2*H*W + c*H*W + hp*W + wp, h*W + w] =
        w[c, kd, hp - h + PAD, wp - w + PAD]   if both offsets are in [0, K)
        0                                      otherwise (H/W zero padding)
    with the channel-mean 1/C folded into channel 0 (conv is linear).
    """
    HW = H * W
    scale = jnp.array([1.0 / C, 1.0], jnp.float32).reshape(2, 1, 1, 1)
    wgt = weight[0].astype(jnp.float32) * scale                  # (2, K, K, K)

    dh = jnp.arange(H)[:, None] - jnp.arange(H)[None, :] + PAD   # [hp, h]
    dw = jnp.arange(W)[:, None] - jnp.arange(W)[None, :] + PAD   # [wp, w]
    valid = (((dh >= 0) & (dh < K))[:, :, None, None]
             & ((dw >= 0) & (dw < K))[None, None, :, :])         # (H, H, W, W)
    dh_c = jnp.clip(dh, 0, K - 1)
    dw_c = jnp.clip(dw, 0, K - 1)
    # g[c, kd, hp, h, wp, w] = wgt[c, kd, dh[hp, h], dw[wp, w]]
    g = wgt[:, :, dh_c[:, :, None, None], dw_c[None, None, :, :]]  # (2,K,H,H,W,W)
    g = jnp.where(valid[None, None], g, 0.0)
    g = jnp.transpose(g, (1, 0, 2, 4, 3, 5))                     # (kd,c,hp,wp,h,w)
    return g.reshape(K * 2 * HW, HW)


def spatial_attn(x, weight, *, x_block_bytes=2 << 20):
    """x: (N, C, D, H, W); weight: (1, 2, K, K, K).  Returns (N, 1, D, H, W).

    x_block_bytes: target size of one pipelined x buffer (double-buffered).
    """
    N, C, D, H, W = x.shape
    HW = H * W
    # TODO(synk): when H*W is not a multiple of 128, pad W (or flatten to
    # (D*H, W_pad)) so the lane axis stays 128-dense; lane-sparse output
    # blocks fall back to masked vst partial stores.

    # --- budget-driven channel tiling (not divisor-driven) -----------------
    per_c = D * HW * x.dtype.itemsize
    c_tile = int(max(1, min(C, x_block_bytes // per_c)))
    n_c = int(pl.cdiv(C, c_tile))

    # TODO(synk): for large H*W the (K*2*H*W, H*W) im2col weight matrix grows
    # quadratically (14*(H*W)^2 bytes in bf16); in that regime tile H (rows =
    # D*H_tile, fold only (c, kh, kw) into a band matrix along W) or keep m in
    # HBM and DMA kd-slices — required before v7x's 64 MiB VMEM is hit.
    m = _build_im2col_weights(weight, C, H, W).astype(jnp.bfloat16)

    x4 = x.reshape(N, C, D, HW)                       # free contiguous reshape

    kernel = _make_kernel(C, c_tile, n_c, D, HW)

    halo_scratch = pltpu.VMEM((D + 2 * PAD, 2 * HW), jnp.float32)
    # im2col weights: one resident VMEM copy (no per-step DMA, single buffer).
    m_spec = pl.BlockSpec(memory_space=pltpu.MemorySpace.VMEM)

    if n_c == 1:
        grid = (N,)
        in_specs = [pl.BlockSpec((None, C, D, HW), lambda n: (n, 0, 0, 0)),
                    m_spec]
        out_specs = pl.BlockSpec((None, D, HW), lambda n: (n, 0, 0))
        scratch_shapes = [halo_scratch]
        dim_sem = ("parallel",)
        acc_bytes = 0
    else:
        grid = (N, n_c)
        in_specs = [pl.BlockSpec((None, c_tile, D, HW),
                                 lambda n, c: (n, c, 0, 0)),
                    m_spec]
        out_specs = pl.BlockSpec((None, D, HW), lambda n, c: (n, 0, 0))
        scratch_shapes = [pltpu.VMEM((D, 2 * HW), jnp.float32), halo_scratch]
        dim_sem = ("parallel", "arbitrary")
        acc_bytes = D * 2 * HW * 4
    # TODO(synk): on v7x with N < 2, add a D-split parallel axis (per-sub-plane
    # channel reduce + depth halo exchange) so both TensorCores stay busy.

    # VMEM footprint estimate -> only raise the scoped limit when needed
    # (v5e default is 16 MiB; demo shapes stay far below it).
    x_blk_bytes = c_tile * D * HW * x.dtype.itemsize
    out_blk_bytes = D * HW * x.dtype.itemsize
    halo_bytes = (D + 2 * PAD) * 2 * HW * 4
    est = (2 * x_blk_bytes + m.size * m.dtype.itemsize
           + 2 * out_blk_bytes + halo_bytes + acc_bytes)
    cp_kwargs = {"dimension_semantics": dim_sem}
    if est > (12 << 20):
        cp_kwargs["vmem_limit_bytes"] = min(int(est * 3 // 2) + (4 << 20),
                                            110 << 20)

    out = pl.pallas_call(
        kernel,
        out_shape=jax.ShapeDtypeStruct((N, D, HW), x.dtype),
        grid_spec=pltpu.PrefetchScalarGridSpec(
            num_scalar_prefetch=0,
            grid=grid,
            in_specs=in_specs,
            out_specs=out_specs,
            scratch_shapes=scratch_shapes,
        ),
        compiler_params=pltpu.CompilerParams(**cp_kwargs),
    )(x4, m)

    return out.reshape(N, 1, D, H, W)


if __name__ == "__main__":
    key = jax.random.PRNGKey(0)
    kx, kw_key, kx2 = jax.random.split(key, 3)

    # Deterministic weight init (matches nn.Conv3d default U(-1/sqrt(fan_in), .)).
    fan_in = 2 * K * K * K
    bound = 1.0 / (fan_in ** 0.5)
    weight = jax.random.uniform(kw_key, (1, 2, K, K, K), jnp.float32,
                                minval=-bound, maxval=bound)

    def reference(x, w):
        avg = jnp.mean(x, axis=1, keepdims=True)
        mx = jnp.max(x, axis=1, keepdims=True)
        feat = jnp.concatenate([avg, mx], axis=1)
        r = lax.conv_general_dilated(
            feat, w, window_strides=(1, 1, 1), padding=[(PAD, PAD)] * 3,
            dimension_numbers=("NCDHW", "OIDHW", "NCDHW"),
            precision=lax.Precision.HIGHEST)
        return jax.nn.sigmoid(r)

    # Case 1: whole C in one block -> grid (N,), no cross-step scratch.
    # H*W = 128 so the flattened plane is exactly one lane tile.
    N, C, D, H, W = 2, 4, 8, 8, 16
    x = jax.random.normal(kx, (N, C, D, H, W), dtype=jnp.float32)
    out = jax.block_until_ready(spatial_attn(x, weight))
    ref = reference(x, weight)
    assert out.shape == (N, 1, D, H, W)
    err = float(jnp.max(jnp.abs(out - ref)))
    # 3e-3 tolerance covers bf16 storage of the im2col weights (f32 accumulate).
    assert err < 3e-3, f"case1 mismatch vs JAX reference: {err}"

    # Case 2: force the multi-step C reduction with a ragged last tile
    # (C=5, c_tile=2 -> 3 channel steps, last tile half valid) to exercise the
    # aligned accumulate scratch and the sum/max masking path.
    C2 = 5
    x2 = jax.random.normal(kx2, (N, C2, D, H, W), dtype=jnp.float32)
    out2 = jax.block_until_ready(
        spatial_attn(x2, weight, x_block_bytes=2 * D * H * W * 4))
    ref2 = reference(x2, weight)
    err2 = float(jnp.max(jnp.abs(out2 - ref2)))
    assert err2 < 3e-3, f"case2 (ragged C) mismatch vs JAX reference: {err2}"

    print("KERNEL_OK")
</pallas_src>

<mosaic_0001>
module attributes {stable_mosaic.version = 11 : i64} {
  func.func @kernel(%arg0: i32, %arg1: memref<1x4x8x128xf32, #tpu.memory_space<vmem>>, %arg2: memref<1792x128xbf16, #tpu.memory_space<vmem>>, %arg3: memref<1x8x128xf32, #tpu.memory_space<vmem>>, %arg4: memref<14x256xf32, #tpu.memory_space<vmem>>) attributes {dimension_semantics = [#tpu.dimension_semantics<parallel>], iteration_bounds = array<i64: 2>, scalar_prefetch = 0 : i64, scratch_operands = 1 : i64, tpu.core_type = #tpu.core_type<tc>, window_params = [{transform_indices = @transform_0, window_bounds = array<i64: 1, 4, 8, 128>}, {pipeline_mode = #tpu.pipeline_mode<synchronous>, transform_indices = @transform_1, window_bounds = array<i64: 1792, 128>}, {transform_indices = @transform_2, window_bounds = array<i64: 1, 8, 128>}]} {
    %c0 = arith.constant 0 : index
    %c0_0 = arith.constant 0 : index
    %c0_1 = arith.constant 0 : index
    %c0_2 = arith.constant 0 : index
    %0 = vector.load %arg1[%c0, %c0_0, %c0_1, %c0_2] : memref<1x4x8x128xf32, #tpu.memory_space<vmem>>, vector<1x4x8x128xf32>
    %1 = vector.shape_cast %0 : vector<1x4x8x128xf32> to vector<4x8x128xf32>
    %cst = arith.constant dense<0.000000e+00> : vector<8x128xf32>
    %2 = vector.multi_reduction <add>, %1, %cst [0] : vector<4x8x128xf32> to vector<8x128xf32>
    %cst_3 = arith.constant dense<0xFF800000> : vector<8x128xf32>
    %3 = vector.multi_reduction <maximumf>, %1, %cst_3 [0] : vector<4x8x128xf32> to vector<8x128xf32>
    %cst_4 = arith.constant 0.000000e+00 : f32
    %4 = vector.broadcast %cst_4 : f32 to vector<3x256xf32>
    %c0_5 = arith.constant 0 : index
    %c0_6 = arith.constant 0 : index
    %5 = vector.load %arg4[%c0_5, %c0_6] : memref<14x256xf32, #tpu.memory_space<vmem>>, vector<3x256xf32>
    tpu.vector_store %arg4[%c0_5, %c0_6], %4 {strides = array<i32>} : memref<14x256xf32, #tpu.memory_space<vmem>>, vector<3x256xf32>,
    %cst_7 = arith.constant 0.000000e+00 : f32
    %6 = vector.broadcast %cst_7 : f32 to vector<3x256xf32>
    %c11 = arith.constant 11 : index
    %c0_8 = arith.constant 0 : index
    %7 = vector.load %arg4[%c11, %c0_8] : memref<14x256xf32, #tpu.memory_space<vmem>>, vector<3x256xf32>
    tpu.vector_store %arg4[%c11, %c0_8], %6 {strides = array<i32>} : memref<14x256xf32, #tpu.memory_space<vmem>>, vector<3x256xf32>,
    %c3 = arith.constant 3 : index
    %c0_9 = arith.constant 0 : index
    %8 = vector.load %arg4[%c3, %c0_9] : memref<14x256xf32, #tpu.memory_space<vmem>>, vector<8x128xf32>
    tpu.vector_store %arg4[%c3, %c0_9], %2 {strides = array<i32>} : memref<14x256xf32, #tpu.memory_space<vmem>>, vector<8x128xf32>,
    %c3_10 = arith.constant 3 : index
    %c128 = arith.constant 128 : index
    %9 = vector.load %arg4[%c3_10, %c128] : memref<14x256xf32, #tpu.memory_space<vmem>>, vector<8x128xf32>
    tpu.vector_store %arg4[%c3_10, %c128], %3 {strides = array<i32>} : memref<14x256xf32, #tpu.memory_space<vmem>>, vector<8x128xf32>,
    %cst_11 = arith.constant 0.000000e+00 : f32
    %10 = vector.broadcast %cst_11 : f32 to vector<8x128xf32>
    %c0_12 = arith.constant 0 : index
    %c0_13 = arith.constant 0 : index
    %11 = vector.load %arg4[%c0_12, %c0_13] : memref<14x256xf32, #tpu.memory_space<vmem>>, vector<8x256xf32>
    %12 = arith.truncf %11 : vector<8x256xf32> to vector<8x256xbf16>
    %c0_14 = arith.constant 0 : index
    %c0_15 = arith.constant 0 : index
    %13 = vector.load %arg2[%c0_14, %c0_15] : memref<1792x128xbf16, #tpu.memory_space<vmem>>, vector<256x128xbf16>
    %cst_16 = arith.constant dense<0.000000e+00> : vector<8x128xf32>
    %14 = tpu.matmul %12, %13, %cst_16 {dimension_numbers = #tpu.dot_dimension_numbers<[1], [0], [0], [1], [0, 0, 1, 1], [], []>} : vector<8x256xbf16>, vector<256x128xbf16>, vector<8x128xf32> -> vector<8x128xf32>
    %15 = arith.addf %10, %14 : vector<8x128xf32>
    %c1 = arith.constant 1 : index
    %c0_17 = arith.constant 0 : index
    %16 = vector.load %arg4[%c1, %c0_17] : memref<14x256xf32, #tpu.memory_space<vmem>>, vector<8x256xf32>
    %17 = arith.truncf %16 : vector<8x256xf32> to vector<8x256xbf16>
    %c256 = arith.constant 256 : index
    %c0_18 = arith.constant 0 : index
    %18 = vector.load %arg2[%c256, %c0_18] : memref<1792x128xbf16, #tpu.memory_space<vmem>>, vector<256x128xbf16>
    %cst_19 = arith.constant dense<0.000000e+00> : vector<8x128xf32>
    %19 = tpu.matmul %17, %18, %cst_19 {dimension_numbers = #tpu.dot_dimension_numbers<[1], [0], [0], [1], [0, 0, 1, 1], [], []>} : vector<8x256xbf16>, vector<256x128xbf16>, vector<8x128xf32> -> vector<8x128xf32>
    %20 = arith.addf %15, %19 : vector<8x128xf32>
    %c2 = arith.constant 2 : index
    %c0_20 = arith.constant 0 : index
    %21 = vector.load %arg4[%c2, %c0_20] : memref<14x256xf32, #tpu.memory_space<vmem>>, vector<8x256xf32>
    %22 = arith.truncf %21 : vector<8x256xf32> to vector<8x256xbf16>
    %c512 = arith.constant 512 : index
    %c0_21 = arith.constant 0 : index
    %23 = vector.load %arg2[%c512, %c0_21] : memref<1792x128xbf16, #tpu.memory_space<vmem>>, vector<256x128xbf16>
    %cst_22 = arith.constant dense<0.000000e+00> : vector<8x128xf32>
    %24 = tpu.matmul %22, %23, %cst_22 {dimension_numbers = #tpu.dot_dimension_numbers<[1], [0], [0], [1], [0, 0, 1, 1], [], []>} : vector<8x256xbf16>, vector<256x128xbf16>, vector<8x128xf32> -> vector<8x128xf32>
    %25 = arith.addf %20, %24 : vector<8x128xf32>
    %c3_23 = arith.constant 3 : index
    %c0_24 = arith.constant 0 : index
    %26 = vector.load %arg4[%c3_23, %c0_24] : memref<14x256xf32, #tpu.memory_space<vmem>>, vector<8x256xf32>
    %27 = arith.truncf %26 : vector<8x256xf32> to vector<8x256xbf16>
    %c768 = arith.constant 768 : index
    %c0_25 = arith.constant 0 : index
    %28 = vector.load %arg2[%c768, %c0_25] : memref<1792x128xbf16, #tpu.memory_space<vmem>>, vector<256x128xbf16>
    %cst_26 = arith.constant dense<0.000000e+00> : vector<8x128xf32>
    %29 = tpu.matmul %27, %28, %cst_26 {dimension_numbers = #tpu.dot_dimension_numbers<[1], [0], [0], [1], [0, 0, 1, 1], [], []>} : vector<8x256xbf16>, vector<256x128xbf16>, vector<8x128xf32> -> vector<8x128xf32>
    %30 = arith.addf %25, %29 : vector<8x128xf32>
    %c4 = arith.constant 4 : index
    %c0_27 = arith.constant 0 : index
    %31 = vector.load %arg4[%c4, %c0_27] : memref<14x256xf32, #tpu.memory_space<vmem>>, vector<8x256xf32>
    %32 = arith.truncf %31 : vector<8x256xf32> to vector<8x256xbf16>
    %c1024 = arith.constant 1024 : index
    %c0_28 = arith.constant 0 : index
    %33 = vector.load %arg2[%c1024, %c0_28] : memref<1792x128xbf16, #tpu.memory_space<vmem>>, vector<256x128xbf16>
    %cst_29 = arith.constant dense<0.000000e+00> : vector<8x128xf32>
    %34 = tpu.matmul %32, %33, %cst_29 {dimension_numbers = #tpu.dot_dimension_numbers<[1], [0], [0], [1], [0, 0, 1, 1], [], []>} : vector<8x256xbf16>, vector<256x128xbf16>, vector<8x128xf32> -> vector<8x128xf32>
    %35 = arith.addf %30, %34 : vector<8x128xf32>
    %c5 = arith.constant 5 : index
    %c0_30 = arith.constant 0 : index
    %36 = vector.load %arg4[%c5, %c0_30] : memref<14x256xf32, #tpu.memory_space<vmem>>, vector<8x256xf32>
    %37 = arith.truncf %36 : vector<8x256xf32> to vector<8x256xbf16>
    %c1280 = arith.constant 1280 : index
    %c0_31 = arith.constant 0 : index
    %38 = vector.load %arg2[%c1280, %c0_31] : memref<1792x128xbf16, #tpu.memory_space<vmem>>, vector<256x128xbf16>
    %cst_32 = arith.constant dense<0.000000e+00> : vector<8x128xf32>
    %39 = tpu.matmul %37, %38, %cst_32 {dimension_numbers = #tpu.dot_dimension_numbers<[1], [0], [0], [1], [0, 0, 1, 1], [], []>} : vector<8x256xbf16>, vector<256x128xbf16>, vector<8x128xf32> -> vector<8x128xf32>
    %40 = arith.addf %35, %39 : vector<8x128xf32>
    %c6 = arith.constant 6 : index
    %c0_33 = arith.constant 0 : index
    %41 = vector.load %arg4[%c6, %c0_33] : memref<14x256xf32, #tpu.memory_space<vmem>>, vector<8x256xf32>
    %42 = arith.truncf %41 : vector<8x256xf32> to vector<8x256xbf16>
    %c1536 = arith.constant 1536 : index
    %c0_34 = arith.constant 0 : index
    %43 = vector.load %arg2[%c1536, %c0_34] : memref<1792x128xbf16, #tpu.memory_space<vmem>>, vector<256x128xbf16>
    %cst_35 = arith.constant dense<0.000000e+00> : vector<8x128xf32>
    %44 = tpu.matmul %42, %43, %cst_35 {dimension_numbers = #tpu.dot_dimension_numbers<[1], [0], [0], [1], [0, 0, 1, 1], [], []>} : vector<8x256xbf16>, vector<256x128xbf16>, vector<8x128xf32> -> vector<8x128xf32>
    %45 = arith.addf %40, %44 : vector<8x128xf32>
    %46 = arith.negf %45 : vector<8x128xf32>
    %47 = math.exp %46 : vector<8x128xf32>
    %cst_36 = arith.constant 1.000000e+00 : f32
    %48 = vector.broadcast %cst_36 : f32 to vector<8x128xf32>
    %49 = arith.addf %48, %47 : vector<8x128xf32>
    %50 = arith.divf %48, %49 : vector<8x128xf32>
    %c0_37 = arith.constant 0 : index
    %c0_38 = arith.constant 0 : index
    %c0_39 = arith.constant 0 : index
    %51 = vector.load %arg3[%c0_37, %c0_38, %c0_39] : memref<1x8x128xf32, #tpu.memory_space<vmem>>, vector<1x8x128xf32>
    %52 = vector.shape_cast %51 : vector<1x8x128xf32> to vector<8x128xf32>
    %53 = vector.shape_cast %50 : vector<8x128xf32> to vector<1x8x128xf32>
    tpu.vector_store %arg3[%c0_37, %c0_38, %c0_39], %53 {strides = array<i32>} : memref<1x8x128xf32, #tpu.memory_space<vmem>>, vector<1x8x128xf32>,
    return
  }
  func.func @transform_0(%arg0: i32) -> (i32, i32, i32, i32) {
    %c0_i32 = arith.constant 0 : i32
    %c0_i32_0 = arith.constant 0 : i32
    %c0_i32_1 = arith.constant 0 : i32
    %c0_i32_2 = arith.constant 0 : i32
    return %arg0, %c0_i32, %c0_i32_0, %c0_i32_1 : i32, i32, i32, i32
  }
  func.func @transform_1(%arg0: i32) -> (i32, i32) {
    %c0_i32 = arith.constant 0 : i32
    %c0_i32_0 = arith.constant 0 : i32
    %c0_i32_1 = arith.constant 0 : i32
    return %c0_i32, %c0_i32_0 : i32, i32
  }
  func.func @transform_2(%arg0: i32) -> (i32, i32, i32) {
    %c0_i32 = arith.constant 0 : i32
    %c0_i32_0 = arith.constant 0 : i32
    %c0_i32_1 = arith.constant 0 : i32
    return %arg0, %c0_i32, %c0_i32_0 : i32, i32, i32
  }
}

</mosaic_0001>

<bundles_post_ra>
// kernel: tpu_custom_call.1
= control target key start
LH: loop header
LB: loop body
LE: loop exit
PB: predicated region body
PF: predicated region fallthrough
CT: control target
= control target key end

     0   :  { %7 = vsyncpa [#allocation4], 0  ;;  %s2378_s0 = inlined_call_operand.hbm [shape: f32[2,4,8,128], index: 0, kind: input, shape index: {}]   ;;  %s2379_s1 = inlined_call_operand.hbm [shape: bf16[1792,128], index: 1, kind: input, shape index: {}]   ;;  %s2380_s2 = inlined_call_operand.hbm [shape: f32[2,8,128], index: 2, kind: output, shape index: {}]  }
   0x1   :  { %9 = vsyncpa [#allocation4 + $0x1], 0 }
   0x2   :  { %10 = vsyncpa [#allocation7], 0 }
   0x3   :  { %11 = vsyncpa [#allocation5], 0 }
   0x4   :  { %13 = vsyncpa [#allocation5 + $0x1], 0  ;;  %s2202_s9 = smov 0   ;;  %s2204_s10 = smov 0  }
   0x5   :  { %s2206_s11 = smov 0   ;;  %s2208_s12 = smov 0  }
   0x6 LB: > { %s2223_s13 = sadd.s32 4294967295, %s2177_s12   ;;  %s1594_s14 = sadd.s32 4294967294, %s2177_s12   ;;  %s2177_s12 = sphi %s2208_s12, %s2402_s12   ;;  %s2173_s11 = sphi %s2206_s11, %s2401_s11   ;;  %s2169_s10 = sphi %s2204_s10, %s2400_s10   ;;  %s2165_s9 = sphi %s2202_s9, %s2399_s9  }
   0x7   : > { %p39_p0 = scmp.ne.s32.totalorder %s2169_s10, %s2165_s9  ;;  %p2381_p1 = scmp.eq.s32.totalorder %s2223_s13, 0 }
   0x8   : > { %p90_p3 = scmp.eq.s32.totalorder %s1594_s14, 1  ;;  %p1595_p5 = scmp.ge.s32.totalorder %s2177_s12, 1 }
   0x9   : > { %p2232_p4 = por %p2381_p1, %p39_p0  ;;  %p97_p7 = scmp.lt.s32.totalorder %s2177_s12, 3 }
   0xa   : > { %p2237_p6 = por %p90_p3, %p39_p0  ;;  %s2179_s18 = smov [#allocation6]  }
   0xb   : > { %s2385_s15 = scalar_select %p2232_p4, 1, 0 }
   0xc   : > { %s2386_s16 = scalar_select %p2237_p6, 1, 0 }
   0xd   : > { %p2242_p8 = pnand %p1595_p5, %p97_p7  ;;  %s109_s19 = sshll.u32 %s2179_s18, 4  ;;  %s110_s19 = int_to_ptr.vmem [resolvable:$true] %s109_s19 }
   0xe   : > { %s2256_s21 = sadd.s32 1, %s2177_s12   ;;  %s26_s22 = sadd.s32 1, %s2173_s11 }
   0xf   : > { %s2387_s17 = scalar_select %p2242_p8, 1, 0 }
  0x10   : > { %p1885_p9 = pneg %p2242_p8  ;;  %s23_s23 = ssub.s32 %s2177_s12, %s2256_s21 }
  0x11   : > { %s2066_s24 = scalar_lea.vmem %s110_s19, 14336  ;;  %p2074_p5 = scmp.lt.s32.totalorder %s110_s19, %s110_s19 }
  0x12   : > { %p2251_p11 = pnand %p1885_p9, %p2381_p1  ;;  %p2067_p13 = scmp.ne.s32.totalorder %s110_s19, %s2066_s24 }
  0x13   : > { %p2075_p7 = scmp.lt.s32.totalorder %s2066_s24, %s2066_s24 }
  0x14   : > { %p2057_p12 = pneg %p2251_p11 }
  0x15   : > { %p2076_p10 = por %p2075_p7, %p2074_p5 }
  0x16   : > { %p2069_p0 = pnand %p2067_p13, %p2057_p12 }
  0x18   : > { %p2070_p3 = pneg %p2069_p0 }
  0x1a   : > { %p2077_p2 = pnand %p2076_p10, %p2070_p3 }
  0x1c   : > { %2080 = shalt.err (!%p2077_p2)
}
  0x1d   : > { %s2180_s25 = smov 64   ;;  %s2181_s26 = smov 4  }
  0x1e   : > { %1888 = dma.hbm_to_vmem [thread:$0]  (!%p2251_p11), %s2379_s1, 14336, %s110_s19, [#allocation7], %s2180_s25, %s2180_s25, %s2181_s26  }
  0x1f   : > { %p24_p9 = scmp.eq.s32.totalorder %s23_s23, 0  ;;  %p33_p12 = scmp.ne.s32.totalorder %s2173_s11, %s2169_s10 }
  0x20   : > { %p34_p10 = scmp.eq.s32.totalorder %s2177_s12, 0  ;;  %p1898_p2 = scmp.lt.s32.totalorder %s2177_s12, 2 }
  0x21   : > { %s2273_s29 = scalar_select %p24_p9, %s2173_s11, %s26_s22  }
  0x22   : > { %p35_p13 = por %p34_p10, %p33_p12  ;;  %p2389_p0 = scmp.eq.s32.totalorder %s2223_s13, 1 }
  0x23   : > { %s123_s3 = sand.u32 1, %s2173_s11   ;;  %s1722_s4 = sshll.u32 %s2177_s12, 9 }
  0x24   : > { %p2277_p3 = por %p2389_p0, %p33_p12  ;;  %s1598_s5 = sshll.u32 %s123_s3, 5 }
  0x25   : > { %s2286_s8 = scalar_lea.hbm %s2378_s0, %s1722_s4  ;;  %s127_s14 = scalar_lea.vmem [#allocation3], %s1598_s5 }
  0x26   : > { %s2390_s30 = scalar_select %p2277_p3, 1, 0 }
  0x27   : > { %s134_s18 = sshll.u32 %s127_s14, 4  ;;  %p2288_p11 = pnand %p1898_p2, %p35_p13  ;;  %s2292_s18 = int_to_ptr.vmem [resolvable:$true] %s134_s18 }
  0x28   : > { %s2294_s20 = scalar_lea.sflag [#allocation4], %s123_s3  ;;  %s2081_s22 = scalar_lea.hbm %s2286_s8, 512 }
  0x29   : > { %p2082_p5 = scmp.ne.s32.totalorder %s2286_s8, %s2081_s22  ;;  %p2083_p7 = pneg %p2288_p11 }
  0x2a   : > { %s2086_s25 = scalar_lea.hbm %s2378_s0, 1024  ;;  %p2087_p10 = scmp.lt.s32.totalorder %s2286_s8, %s2378_s0 }
  0x2b   : > { %p2084_p9 = pnand %p2083_p7, %p2082_p5  ;;  %p2088_p2 = scmp.lt.s32.totalorder %s2086_s25, %s2081_s22 }
  0x2d   : > { %p2085_p12 = pneg %p2084_p9  ;;  %p2089_p13 = por %p2088_p2, %p2087_p10 }
  0x2f   : > { %p2090_p0 = pnand %p2089_p13, %p2085_p12 }
  0x31   : > { %2093 = shalt.err (!%p2090_p0)
}
  0x32   : > { %s2094_s28 = scalar_lea.vmem %s2292_s18, 512  ;;  %s2182_s3 = smov [#allocation3]  }
  0x33   : > { %p2095_p1 = scmp.ne.s32.totalorder %s2292_s18, %s2094_s28  ;;  %s2099_s4 = sshll.u32 %s2182_s3, 4  ;;  %s2100_s4 = int_to_ptr.vmem [resolvable:$false] %s2099_s4 }
  0x34   : > { %s2101_s5 = scalar_lea.vmem %s2100_s4, 1024  ;;  %p2102_p9 = scmp.lt.s32.totalorder %s2292_s18, %s2100_s4 }
  0x35   : > { %p2097_p6 = pnand %p2095_p1, %p2083_p7  ;;  %p2103_p3 = scmp.lt.s32.totalorder %s2101_s5, %s2094_s28 }
  0x37   : > { %p2098_p5 = pneg %p2097_p6  ;;  %p2104_p4 = por %p2103_p3, %p2102_p9 }
  0x39   : > { %p2105_p8 = pnand %p2104_p4, %p2098_p5 }
  0x3b   : > { %2108 = shalt.err (!%p2105_p8)
}
  0x3c   : > { %s2183_s6 = smov 128   ;;  %s2184_s7 = smov 8  }
  0x3d   : > { %1892 = dma.hbm_to_vmem [thread:$0]  (!%p2288_p11), %s2286_s8, 512, %s2292_s18, %s2294_s20, %s2183_s6, %s2183_s6, %s2184_s7  }
  0x3e   : > { %p2392_p1 = scmp.ne.s32.totalorder %s2387_s17, 0 }
  0x3f   : > { %s2318_s14 = sand.u32 (!%p2392_p1), 1, %s2169_s10   ;;  %p2393_p4 = scmp.ne.s32.totalorder (!%p2392_p1), %s2385_s15, 0 }
  0x40   : > { %146 = sbr.rel (%p2392_p1) target bundleno = 450 (0x1c2), region = 28  ;;  %s1602_s22 = sshll.u32 (!%p2392_p1), %s2318_s14, 5 }
  0x41   : > { %s149_s23 = scalar_lea.sflag (!%p2392_p1), [#allocation4], %s2318_s14  ;;  %s2322_s24 = scalar_lea.vmem (!%p2392_p1), [#allocation3], %s1602_s22 }
  0x45   : > { %2152 = dma.done.wait (%p2393_p4), %s149_s23, 512  }
  0x46   : > { %2154 = vsyncadd (%p2393_p4), %s149_s23, 4294966784  ;;  %p2394_p6 = scmp.eq.s32.totalorder %s2223_s13, 0 }
  0x48   : > { %2156 = dma.done.wait (%p2394_p6), [#allocation7], 14336   ;;  %p2395_p8 = pmov %p2394_p6 }
  0x49   : > { %v2185_v0 = vmov 0.0   ;;  %v1939_v1 = vld [vmem:[#allocation6 + $0xf8] sm:$0xff]   ;;  %v1943_v5 = vld [vmem:[#allocation6 + $0xf0] sm:$0xff]   ;;  %v1947_v9 = vld [vmem:[#allocation6 + $0xe8] sm:$0xff]   ;;  %s1604_s15 = sshll.u32 %s2318_s14, 3  ;;  %s1719_s17 = sshll.u32 %s2223_s13, 7 }
  0x4a   : > { %2158 = vsyncadd (%p2395_p8), [#allocation7], 4294952960  ;;  %189 = vst [vmem:[#allocation2] sm:$0x7] %v2185_v0  ;;  %v1940_v2 = vld [vmem:[#allocation6 + $0x78] sm:$0xff]   ;;  %1723 = vmatprep.subr.bf16.mxu0 %v1939_v1  ;;  %v1944_v6 = vld [vmem:[#allocation6 + $0x70] sm:$0xff]   ;;  %s2341_s25 = scalar_lea.hbm %s2380_s2, %s1719_s17 }
  0x4b   : > { %188 = vst [vmem:[#allocation2 + $0x10] sm:$0x7] %v2185_v0  ;;  %190 = vst [vmem:[#allocation2 + $0x18] sm:$0x38] %v2185_v0  ;;  %v1941_v3 = vld [vmem:[#allocation6 + $0xb8] sm:$0xff]   ;;  %1745 = vmatprep.subr.bf16.mxu1 %v1940_v2  ;;  %v1945_v7 = vld [vmem:[#allocation6 + $0xb0] sm:$0xff]  }
  0x4c   : > { %191 = vst [vmem:[#allocation2 + $0x8] sm:$0x38] %v2185_v0  ;;  %v1942_v4 = vld [vmem:[#allocation6 + $0x38] sm:$0xff]   ;;  %1724 = vmatpush3.bf16.msra.mxu0 %v1941_v3  ;;  %v1946_v8 = vld [vmem:[#allocation6 + $0x30] sm:$0xff]   ;;  %v1948_v10 = vld [vmem:[#allocation6 + $0x68] sm:$0xff]   ;;  %s176_s8 = scalar_lea.vmem [#allocation8], %s1604_s15 }
  0x4d   : > { %1746 = vmatpush3.bf16.msra.mxu1 %v1942_v4  ;;  %1725 = vmatprep.subr.bf16.mxu0 %v1943_v5  ;;  %v1949_v11 = vld [vmem:[#allocation6 + $0xa8] sm:$0xff]   ;;  %v1951_v13 = vld [vmem:[#allocation6 + $0xe0] sm:$0xff]   ;;  %v1955_v17 = vld [vmem:[#allocation6 + $0xd8] sm:$0xff]   ;;  %s1514_s18 = sshll.u32 %s176_s8, 4  ;;  %s1501_s26 = scalar_lea.sflag [#allocation5], %s2318_s14  ;;  %s1515_s18 = int_to_ptr.vmem [resolvable:$true] %s1514_s18 }
  0x4e   : > { %1747 = vmatprep.subr.bf16.mxu1 %v1944_v6  ;;  %v1950_v12 = vld [vmem:[#allocation6 + $0x28] sm:$0xff]   ;;  %v1952_v14 = vld [vmem:[#allocation6 + $0x60] sm:$0xff]   ;;  %v1956_v18 = vld [vmem:[#allocation6 + $0x58] sm:$0xff]   ;;  %s2109_s27 = scalar_lea.vmem %s1515_s18, 128  ;;  %p2396_p11 = scmp.ne.s32.totalorder %s2390_s30, 0 }
  0x4f   : > { %v1953_v15 = vld [vmem:[#allocation6 + $0xa0] sm:$0xff]   ;;  %v1957_v19 = vld [vmem:[#allocation6 + $0x98] sm:$0xff]   ;;  %v1959_v21 = vld [vmem:[#allocation6 + $0xd0] sm:$0xff]   ;;  %p2110_p3 = scmp.ne.s32.totalorder %s1515_s18, %s2109_s27  ;;  %s2186_s28 = smov [#allocation8]  }
  0x50   : > { %1726 = vmatpush3.bf16.msra.mxu0 %v1945_v7  ;;  %v1954_v16 = vld [vmem:[#allocation6 + $0x20] sm:$0xff]   ;;  %v1958_v20 = vld [vmem:[#allocation6 + $0x18] sm:$0xff]   ;;  %v1960_v22 = vld [vmem:[#allocation6 + $0x50] sm:$0xff]   ;;  %s2113_s3 = sshll.u32 %s2186_s28, 4  ;;  %s2114_s3 = int_to_ptr.vmem [resolvable:$false] %s2113_s3 }
  0x51   : > { %1748 = vmatpush3.bf16.msra.mxu1 %v1946_v8  ;;  %1727 = vmatprep.subr.bf16.mxu0 %v1947_v9  ;;  %v1961_v23 = vld [vmem:[#allocation6 + $0x90] sm:$0xff]   ;;  %v1963_v25 = vld [vmem:[#allocation6 + $0xc8] sm:$0xff]   ;;  %v1967_v29 = vld [vmem:[#allocation6 + $0xc0] sm:$0xff]   ;;  %p2111_p7 = pnand %p2110_p3, %p2396_p11  ;;  %s2115_s13 = scalar_lea.vmem %s2114_s3, 256 }
  0x52   : > { %1749 = vmatprep.subr.bf16.mxu1 %v1948_v10  ;;  %v1962_v24 = vld [vmem:[#allocation6 + $0x10] sm:$0xff]   ;;  %v1964_v26 = vld [vmem:[#allocation6 + $0x48] sm:$0xff]   ;;  %v1968_v30 = vld [vmem:[#allocation6 + $0x40] sm:$0xff]   ;;  %p2116_p10 = scmp.lt.s32.totalorder %s1515_s18, %s2114_s3  ;;  %p2117_p2 = scmp.lt.s32.totalorder %s2115_s13, %s2109_s27 }
  0x53   : > { %v1965_v27 = vld [vmem:[#allocation6 + $0x88] sm:$0xff]   ;;  %v1969_v31 = vld [vmem:[#allocation6 + $0x80] sm:$0xff]   ;;  %v180_v35 = vld [vmem:[%s2322_s24 + $0x10] sm:$0xff]  ;;  %p2112_p12 = pneg %p2111_p7 }
  0x54   : > { %1728 = vmatpush3.bf16.msra.mxu0 %v1949_v11  ;;  %v1966_v28 = vld [vmem:[#allocation6 + $0x8] sm:$0xff]   ;;  %v1970_v32 = vld [vmem:[#allocation6] sm:$0xff]   ;;  %v181_v36 = vld [vmem:[%s2322_s24 + $0x18] sm:$0xff]  ;;  %p2118_p13 = por %p2117_p2, %p2116_p10 }
  0x55   : > { %1750 = vmatpush3.bf16.msra.mxu1 %v1950_v12  ;;  %1729 = vmatprep.subr.bf16.mxu0 %v1951_v13  ;;  %v178_v33 = vld [vmem:[%s2322_s24] sm:$0xff]  ;;  %v179_v34 = vld [vmem:[%s2322_s24 + $0x8] sm:$0xff]  ;;  %v186_v39 = vmax.f32 %v180_v35, %v181_v36  ;;  %v1971_v40 = vld [vmem:[#allocation6 + $0x178] sm:$0xff]  }
  0x56   : > { %1751 = vmatprep.subr.bf16.mxu1 %v1952_v14  ;;  %v182_v37 = vadd.f32 %v179_v34, %v178_v33  ;;  %v185_v38 = vmax.f32 %v178_v33, %v179_v34  ;;  %v1973_v43 = vld [vmem:[#allocation6 + $0x1f8] sm:$0xff]   ;;  %v1977_v58 = vld [vmem:[#allocation6 + $0x1f0] sm:$0xff]   ;;  %v1981_v2 = vld [vmem:[#allocation6 + $0x1e8] sm:$0xff]   ;;  %p2119_p0 = pnand %p2118_p13, %p2112_p12 }
  0x57   : > { %v1974_v47 = vld [vmem:[#allocation6 + $0x1b8] sm:$0xff]   ;;  %v1978_v0 = vld [vmem:[#allocation6 + $0x1b0] sm:$0xff]   ;;  %v1982_v7 = vld [vmem:[#allocation6 + $0x1a8] sm:$0xff]  }
  0x58   : > { %1730 = vmatpush3.bf16.msra.mxu0 %v1953_v15  ;;  %v183_v41 = vadd.f32 %v182_v37, %v180_v35  ;;  %v187_v42 = vmax.f32 %v185_v38, %v186_v39  ;;  %v1972_v4 = vld [vmem:[#allocation6 + $0x138] sm:$0xff]   ;;  %v1975_v6 = vld [vmem:[#allocation6 + $0x170] sm:$0xff]   ;;  %v1985_v8 = vld [vmem:[#allocation6 + $0x1e0] sm:$0xff]  }
  0x59   : > { %1752 = vmatpush3.bf16.msra.mxu1 %v1954_v16  ;;  %1731 = vmatprep.subr.bf16.mxu0 %v1955_v17  ;;  %v1976_v9 = vld [vmem:[#allocation6 + $0x130] sm:$0xff]   ;;  %v1979_v10 = vld [vmem:[#allocation6 + $0x168] sm:$0xff]   ;;  %v1986_v11 = vld [vmem:[#allocation6 + $0x1a0] sm:$0xff]  }
  0x5a   : > { %1753 = vmatprep.subr.bf16.mxu1 %v1956_v18  ;;  %v184_v44 = vadd.f32 %v183_v41, %v181_v36  ;;  %v198_v45 = vrot.slane %v187_v42, 5  ;;  %v1989_v12 = vld [vmem:[#allocation6 + $0x1d8] sm:$0xff]   ;;  %v1980_v13 = vld [vmem:[#allocation6 + $0x128] sm:$0xff]   ;;  %v1983_v14 = vld [vmem:[#allocation6 + $0x160] sm:$0xff]  }
  0x5b   : > { %v1984_v15 = vld [vmem:[#allocation6 + $0x120] sm:$0xff]   ;;  %v1990_v16 = vld [vmem:[#allocation6 + $0x198] sm:$0xff]   ;;  %v1993_v17 = vld [vmem:[#allocation6 + $0x1d0] sm:$0xff]  }
  0x5c   : > { %1732 = vmatpush3.bf16.msra.mxu0 %v1957_v19  ;;  %v193_v46 = vrot.slane %v184_v44, 5  ;;  %200 = vst [vmem:[#allocation2] sm:$0xf8] %v198_v45  ;;  %201 = vst [vmem:[#allocation2 + $0x8] sm:$0x7] %v198_v45  ;;  %v1987_v18 = vld [vmem:[#allocation6 + $0x158] sm:$0xff]  }
  0x5d   : > { %1754 = vmatpush3.bf16.msra.mxu1 %v1958_v20  ;;  %1733 = vmatprep.subr.bf16.mxu0 %v1959_v21  ;;  %v1988_v21 = vld [vmem:[#allocation6 + $0x118] sm:$0xff]   ;;  %v1995_v35 = vld [vmem:[#allocation6 + $0x148] sm:$0xff]   ;;  %v2002_v39 = vld [vmem:[#allocation6 + $0x180] sm:$0xff]  }
  0x5e   : > { %1755 = vmatprep.subr.bf16.mxu1 %v1960_v22  ;;  %195 = vst [vmem:[#allocation2 + $0x10] sm:$0xf8] %v193_v46  ;;  %196 = vst [vmem:[#allocation2 + $0x18] sm:$0x7] %v193_v46  ;;  %v1994_v22 = vld [vmem:[#allocation6 + $0x190] sm:$0xff]   ;;  %v1996_v46 = vld [vmem:[#allocation6 + $0x108] sm:$0xff]  }
  0x60   : > { %1734 = vmatpush3.bf16.msra.mxu0 %v1961_v23 }
  0x61   : > { %1756 = vmatpush3.bf16.msra.mxu1 %v1962_v24  ;;  %1735 = vmatprep.subr.bf16.mxu0 %v1963_v25  ;;  %v1991_v24 = vld [vmem:[#allocation6 + $0x150] sm:$0xff]   ;;  %v1997_v25 = vld [vmem:[#allocation6 + $0x1c8] sm:$0xff]  }
  0x62   : > { %1757 = vmatprep.subr.bf16.mxu1 %v1964_v26  ;;  %v1998_v26 = vld [vmem:[#allocation6 + $0x188] sm:$0xff]  }
  0x63   : > { %v239_v48 = vld [vmem:[#allocation2] sm:$0xfe]  ;;  %v241_v49 = vld [vmem:[#allocation2 + $0x8] sm:$0x1] }
  0x64   : > { %1736 = vmatpush3.bf16.msra.mxu0 %v1965_v27  ;;  %v203_v50 = vld [vmem:[#allocation2] sm:$0xff]  ;;  %v243_v51 = vpack.c.bf16 %v241_v49, %v239_v48  ;;  %v567_v20 = vld [vmem:[#allocation2 + $0x8] sm:$0x3] }
  0x65   : > { %1758 = vmatpush3.bf16.msra.mxu1 %v1966_v28  ;;  %1737 = vmatprep.subr.bf16.mxu0 %v1967_v29  ;;  %v205_v52 = vpack.c.bf16 %v203_v50, %v203_v50  ;;  %v238_v53 = vld [vmem:[#allocation2 + $0x10] sm:$0xfe]  ;;  %v240_v54 = vld [vmem:[#allocation2 + $0x18] sm:$0x1]  ;;  %v565_v19 = vld [vmem:[#allocation2] sm:$0xfc] }
  0x66   : > { %1759 = vmatprep.subr.bf16.mxu1 %v1968_v30  ;;  %v202_v55 = vld [vmem:[#allocation2 + $0x10] sm:$0xff]  ;;  %v242_v56 = vpack.c.bf16 %v240_v54, %v238_v53  ;;  %v284_v59 = vshrl.u32 %v243_v51, 16  ;;  %v286_v60 = vshll.u32 %v243_v51, 16  ;;  %v569_v23 = vpack.c.bf16 %v567_v20, %v565_v19  ;;  %v746_v28 = vld [vmem:[#allocation2] sm:$0xf8]  ;;  %v2005_v50 = vld [vmem:[#allocation6 + $0x2f8] sm:$0xff]  }
  0x67   : > { %v204_v57 = vpack.c.bf16 %v202_v55, %v202_v55  ;;  %556 = vmatprep.mubr.bf16.mxu1 %v205_v52  ;;  %v748_v29 = vld [vmem:[#allocation2 + $0x8] sm:$0x7]  ;;  %v2001_v30 = vld [vmem:[#allocation6 + $0x1c0] sm:$0xff]   ;;  %v745_v33 = vld [vmem:[#allocation2 + $0x10] sm:$0xf8] }
  0x68   : > { %1738 = vmatpush3.bf16.msra.mxu0 %v1969_v31  ;;  %v277_v61 = vshrl.u32 %v242_v56, 16  ;;  %v279_v62 = vshll.u32 %v242_v56, 16  ;;  %v288_v63 = vrot.slane %v286_v60, 1  ;;  %v605_v27 = vrot.slane %v569_v23, 1  ;;  %v747_v34 = vld [vmem:[#allocation2 + $0x18] sm:$0x7] }
  0x69   : > { %1760 = vmatpush3.bf16.msra.mxu1 %v1970_v32  ;;  %1767 = vmatprep.subr.bf16.mxu0 %v1971_v40  ;;  %v750_v31 = vpack.c.bf16 %v748_v29, %v746_v28  ;;  %v1992_v32 = vld [vmem:[#allocation6 + $0x110] sm:$0xff]   ;;  %v749_v38 = vpack.c.bf16 %v747_v34, %v745_v33  ;;  %v566_v45 = vld [vmem:[#allocation2 + $0x18] sm:$0x3]  ;;  %v1999_v51 = vld [vmem:[#allocation6 + $0x140] sm:$0xff]  }
  0x6a   : > { %1789 = vmatprep.subr.bf16.mxu1 %v1973_v43  ;;  %v281_v1 = vrot.slane %v279_v62, 1  ;;  %v289_v3 = vor.u32 %v288_v63, %v284_v59  ;;  %v564_v44 = vld [vmem:[#allocation2 + $0x10] sm:$0xfc]  ;;  %v2006_v53 = vld [vmem:[#allocation6 + $0x2b8] sm:$0xff]   ;;  %v2000_v56 = vld [vmem:[#allocation6 + $0x100] sm:$0xff]  }
  0x6b   : > { %v792_v36 = vshrl.u32 %v750_v31, 16  ;;  %v795_v37 = vshll.u32 %v750_v31, 16  ;;  %v784_v42 = vshrl.u32 %v749_v38, 16  ;;  %v787_v43 = vshll.u32 %v749_v38, 16  ;;  %v2009_v55 = vld [vmem:[#allocation6 + $0x2f0] sm:$0xff]   ;;  %v2013_v60 = vld [vmem:[#allocation6 + $0x2e8] sm:$0xff]  }
  0x6c   : > { %557 = vmatmul.mubr.bf16.vlgmr.msra.gmra.mxu1 %v204_v57  ;;  %v282_v5 = vor.u32 %v281_v1, %v277_v61  ;;  %420 = vmatprep.mubr.bf16.mxu0 %v289_v3  ;;  %v568_v54 = vpack.c.bf16 %v566_v45, %v564_v44  ;;  %v2003_v57 = vld [vmem:[#allocation6 + $0x278] sm:$0xff]   ;;  %v2007_v62 = vld [vmem:[#allocation6 + $0x270] sm:$0xff]   ;;  %v2014_v63 = vld [vmem:[#allocation6 + $0x2a8] sm:$0xff]  }
  0x6d   : > { %1790 = vmatpush3.bf16.msra.mxu1 %v1974_v47  ;;  %v794_v40 = vrot.slane %v792_v36, 1  ;;  %v797_v41 = vrot.slane %v795_v37, 2  ;;  %v786_v48 = vrot.slane %v784_v42, 1  ;;  %v789_v49 = vrot.slane %v787_v43, 2  ;;  %v2004_v61 = vld [vmem:[#allocation6 + $0x238] sm:$0xff]   ;;  %v2008_v1 = vld [vmem:[#allocation6 + $0x230] sm:$0xff]  }
  0x6e   : > { %1791 = vmatprep.subr.bf16.mxu1 %v1977_v58  ;;  %421 = vmatmul.mubr.bf16.vlgmr.msra.gmra.mxu0 %v282_v5  ;;  %v2010_v58 = vld [vmem:[#allocation6 + $0x2b0] sm:$0xff]   ;;  %v604_v59 = vrot.slane %v568_v54, 1  ;;  %v2018_v3 = vld [vmem:[#allocation6 + $0x2a0] sm:$0xff]   ;;  %v2012_v5 = vld [vmem:[#allocation6 + $0x228] sm:$0xff]  }
  0x6f   : > { %1768 = vmatpush3.bf16.msra.mxu0 %v1972_v4  ;;  %736 = vmatprep.mubr.bf16.mxu0 %v605_v27  ;;  %v798_v47 = vor.u32 %v797_v41, %v794_v40  ;;  %v790_v52 = vor.u32 %v789_v49, %v786_v48  ;;  %v2021_v4 = vld [vmem:[#allocation6 + $0x2d8] sm:$0xff]   ;;  %v2030_v19 = vld [vmem:[#allocation6 + $0x288] sm:$0xff]   ;;  %v1120_v23 = vld [vmem:[#allocation2] sm:$0xe0] }
  0x70   : > { %1769 = vmatprep.subr.bf16.mxu0 %v1975_v6  ;;  %v2015_v6 = vld [vmem:[#allocation6 + $0x260] sm:$0xff]   ;;  %v2027_v20 = vld [vmem:[#allocation6 + $0x248] sm:$0xff]   ;;  %v1119_v27 = vld [vmem:[#allocation2 + $0x10] sm:$0xe0] }
  0x71   : > { %1792 = vmatpush3.bf16.msra.mxu1 %v1978_v0  ;;  %929 = vmatprep.mubr.bf16.mxu1 %v798_v47  ;;  %v2017_v0 = vld [vmem:[#allocation6 + $0x2e0] sm:$0xff]   ;;  %v1121_v28 = vld [vmem:[#allocation2 + $0x18] sm:$0x1f]  ;;  %v2028_v29 = vld [vmem:[#allocation6 + $0x208] sm:$0xff]  }
  0x72   : > { %1793 = vmatprep.subr.bf16.mxu1 %v1981_v2  ;;  %v2011_v2 = vld [vmem:[#allocation6 + $0x268] sm:$0xff]   ;;  %v1123_v31 = vpack.c.bf16 %v1121_v28, %v1119_v27  ;;  %v2032_v44 = vld [vmem:[#allocation6 + $0x200] sm:$0xff]   ;;  %v2036_v48 = vld [vmem:[#allocation6 + $0x338] sm:$0xff]  }
  0x73   : > { %1770 = vmatpush3.bf16.msra.mxu0 %v1976_v9  ;;  %v2016_v9 = vld [vmem:[#allocation6 + $0x220] sm:$0xff]   ;;  %v2037_v49 = vld [vmem:[#allocation6 + $0x370] sm:$0xff]  }
  0x74   : > { %1771 = vmatprep.subr.bf16.mxu0 %v1979_v10  ;;  %v2019_v10 = vld [vmem:[#allocation6 + $0x258] sm:$0xff]   ;;  %v1158_v36 = vshrl.u32 %v1123_v31, 16  ;;  %v1161_v37 = vshll.u32 %v1123_v31, 16 }
  0x75   : > { %1794 = vmatpush3.bf16.msra.mxu1 %v1982_v7  ;;  %v2022_v7 = vld [vmem:[#allocation6 + $0x298] sm:$0xff]  }
  0x76   : > { %1795 = vmatprep.subr.bf16.mxu1 %v1985_v8  ;;  %v2025_v8 = vld [vmem:[#allocation6 + $0x2d0] sm:$0xff]   ;;  %v1160_v40 = vrot.slane %v1158_v36, 2  ;;  %v1163_v41 = vrot.slane %v1161_v37, 3 }
  0x77   : > { %1772 = vmatpush3.bf16.msra.mxu0 %v1980_v13  ;;  %v2020_v13 = vld [vmem:[#allocation6 + $0x218] sm:$0xff]  }
  0x78   : > { %1773 = vmatprep.subr.bf16.mxu0 %v1983_v14  ;;  %v939_v14 = vld [vmem:[#allocation2] sm:$0xf0]  ;;  %v1164_v45 = vor.u32 %v1163_v41, %v1160_v40 }
  0x79   : > { %1796 = vmatpush3.bf16.msra.mxu1 %v1986_v11  ;;  %v2026_v11 = vld [vmem:[#allocation6 + $0x290] sm:$0xff]  }
  0x7a   : > { %1797 = vmatprep.subr.bf16.mxu1 %v1989_v12  ;;  %v2029_v12 = vld [vmem:[#allocation6 + $0x2c8] sm:$0xff]  }
  0x7b   : > { %1774 = vmatpush3.bf16.msra.mxu0 %v1984_v15  ;;  %v941_v15 = vld [vmem:[#allocation2 + $0x8] sm:$0xf] }
  0x7c   : > { %1775 = vmatprep.subr.bf16.mxu0 %v1987_v18  ;;  %v2024_v18 = vld [vmem:[#allocation6 + $0x210] sm:$0xff]  }
  0x7d   : > { %1798 = vmatpush3.bf16.msra.mxu1 %v1990_v16  ;;  %v2023_v16 = vld [vmem:[#allocation6 + $0x250] sm:$0xff]  }
  0x7e   : > { %1799 = vmatprep.subr.bf16.mxu1 %v1993_v17  ;;  %v943_v17 = vpack.c.bf16 %v941_v15, %v939_v14 }
  0x7f   : > { %1776 = vmatpush3.bf16.msra.mxu0 %v1988_v21  ;;  %v2033_v21 = vld [vmem:[#allocation6 + $0x2c0] sm:$0xff]  }
  0x80   : > { %1777 = vmatprep.subr.bf16.mxu0 %v1991_v24  ;;  %v1122_v24 = vld [vmem:[#allocation2 + $0x8] sm:$0x1f] }
  0x81   : > { %1800 = vmatpush3.bf16.msra.mxu1 %v1994_v22  ;;  %v979_v22 = vrot.slane %v943_v17, 2 }
  0x82   : > { %1801 = vmatprep.subr.bf16.mxu1 %v1997_v25  ;;  %v2034_v25 = vld [vmem:[#allocation6 + $0x280] sm:$0xff]  }
  0x83   : > { %1778 = vmatpush3.bf16.msra.mxu0 %v1992_v32  ;;  %v2031_v32 = vld [vmem:[#allocation6 + $0x240] sm:$0xff]  }
  0x84   : > { %1779 = vmatprep.subr.bf16.mxu0 %v1995_v35  ;;  %v940_v35 = vld [vmem:[#allocation2 + $0x18] sm:$0xf] }
  0x85   : > { %1802 = vmatpush3.bf16.msra.mxu1 %v1998_v26  ;;  %v1124_v26 = vpack.c.bf16 %v1122_v24, %v1120_v23 }
  0x86   : > { %1803 = vmatprep.subr.bf16.mxu1 %v2001_v30  ;;  %v938_v30 = vld [vmem:[#allocation2 + $0x10] sm:$0xf0] }
  0x87   : > { %1780 = vmatpush3.bf16.msra.mxu0 %v1996_v46  ;;  %v1166_v33 = vshrl.u32 %v1124_v26, 16  ;;  %v1169_v34 = vshll.u32 %v1124_v26, 16  ;;  %v942_v42 = vpack.c.bf16 %v940_v35, %v938_v30  ;;  %v2035_v46 = vld [vmem:[#allocation6 + $0x378] sm:$0xff]  }
  0x88   : > { %1781 = vmatprep.subr.bf16.mxu0 %v1999_v51  ;;  %v1313_v51 = vld [vmem:[#allocation2] sm:$0xc0] }
  0x89   : > { %1804 = vmatpush3.bf16.msra.mxu1 %v2002_v39  ;;  %v1168_v38 = vrot.slane %v1166_v33, 2  ;;  %v1171_v39 = vrot.slane %v1169_v34, 3  ;;  %v978_v47 = vrot.slane %v942_v42, 2 }
  0x8a   : > { %1833 = vmatprep.subr.bf16.mxu1 %v2005_v50  ;;  %v2038_v50 = vld [vmem:[#allocation6 + $0x330] sm:$0xff]  }
  0x8b   : > { %1782 = vmatpush3.bf16.msra.mxu0 %v2000_v56  ;;  %v1172_v43 = vor.u32 %v1171_v39, %v1168_v38 }
  0x8c   : > { %930 = vmatmul.mubr.bf16.vlgmr.msra.gmra.mxu1 %v790_v52  ;;  %1811 = vmatprep.subr.bf16.mxu0 %v2003_v57  ;;  %v2039_v52 = vld [vmem:[#allocation6 + $0x368] sm:$0xff]   ;;  %v2041_v57 = vld [vmem:[#allocation6 + $0x360] sm:$0xff]  }
  0x8d   : > { %1834 = vmatpush3.bf16.msra.mxu1 %v2006_v53  ;;  %1303 = vmatprep.mubr.bf16.mxu1 %v1172_v43  ;;  %v1315_v53 = vld [vmem:[#allocation2 + $0x8] sm:$0x3f] }
  0x8e   : > { %1835 = vmatprep.subr.bf16.mxu1 %v2009_v55  ;;  %737 = vmatmul.mubr.bf16.vlgmr.msra.gmra.mxu0 %v604_v59  ;;  %v1317_v54 = vpack.c.bf16 %v1315_v53, %v1313_v51  ;;  %v2040_v55 = vld [vmem:[#allocation6 + $0x328] sm:$0xff]   ;;  %v2043_v59 = vld [vmem:[#allocation6 + $0x358] sm:$0xff]  }
  0x8f   : > { %1812 = vmatpush3.bf16.msra.mxu0 %v2004_v61  ;;  %1110 = vmatprep.mubr.bf16.mxu0 %v979_v22  ;;  %v2045_v61 = vld [vmem:[#allocation6 + $0x350] sm:$0xff]  }
  0x90   : > { %1813 = vmatprep.subr.bf16.mxu0 %v2007_v62  ;;  %v1353_v56 = vrot.slane %v1317_v54, 3  ;;  %v2046_v62 = vld [vmem:[#allocation6 + $0x310] sm:$0xff]  }
  0x91   : > { %1836 = vmatpush3.bf16.msra.mxu1 %v2010_v58  ;;  %v2042_v58 = vld [vmem:[#allocation6 + $0x320] sm:$0xff]  }
  0x92   : > { %1837 = vmatprep.subr.bf16.mxu1 %v2013_v60  ;;  %v2044_v60 = vld [vmem:[#allocation6 + $0x318] sm:$0xff]  }
  0x93   : > { %1814 = vmatpush3.bf16.msra.mxu0 %v2008_v1  ;;  %v1312_v1 = vld [vmem:[#allocation2 + $0x10] sm:$0xc0] }
  0x94   : > { %1815 = vmatprep.subr.bf16.mxu0 %v2011_v2  ;;  %v1314_v2 = vld [vmem:[#allocation2 + $0x18] sm:$0x3f] }
  0x95   : > { %1838 = vmatpush3.bf16.msra.mxu1 %v2014_v63  ;;  %v2047_v63 = vld [vmem:[#allocation6 + $0x348] sm:$0xff]  }
  0x96   : > { %1839 = vmatprep.subr.bf16.mxu1 %v2017_v0  ;;  %v2048_v0 = vld [vmem:[#allocation6 + $0x308] sm:$0xff]  }
  0x97   : > { %1816 = vmatpush3.bf16.msra.mxu0 %v2012_v5  ;;  %v2050_v5 = vld [vmem:[#allocation6 + $0x300] sm:$0xff]  }
  0x98   : > { %1817 = vmatprep.subr.bf16.mxu0 %v2015_v6 }
  0x99   : > { %1840 = vmatpush3.bf16.msra.mxu1 %v2018_v3  ;;  %v2049_v3 = vld [vmem:[#allocation6 + $0x340] sm:$0xff]  }
  0x9a   : > { %1841 = vmatprep.subr.bf16.mxu1 %v2021_v4  ;;  %v1316_v4 = vpack.c.bf16 %v1314_v2, %v1312_v1 }
  0x9b   : > { %1818 = vmatpush3.bf16.msra.mxu0 %v2016_v9 }
  0x9c   : > { %1819 = vmatprep.subr.bf16.mxu0 %v2019_v10  ;;  %v1352_v6 = vrot.slane %v1316_v4, 3 }
  0x9d   : > { %1842 = vmatpush3.bf16.msra.mxu1 %v2022_v7 }
  0x9e   : > { %1843 = vmatprep.subr.bf16.mxu1 %v2025_v8 }
  0x9f   : > { %1820 = vmatpush3.bf16.msra.mxu0 %v2020_v13 }
  0xa0   : > { %1821 = vmatprep.subr.bf16.mxu0 %v2023_v16 }
  0xa1   : > { %1844 = vmatpush3.bf16.msra.mxu1 %v2026_v11 }
  0xa2   : > { %1845 = vmatprep.subr.bf16.mxu1 %v2029_v12 }
  0xa3   : > { %1822 = vmatpush3.bf16.msra.mxu0 %v2024_v18 }
  0xa4   : > { %1823 = vmatprep.subr.bf16.mxu0 %v2027_v20 }
  0xa5   : > { %1846 = vmatpush3.bf16.msra.mxu1 %v2030_v19 }
  0xa6   : > { %1847 = vmatprep.subr.bf16.mxu1 %v2033_v21 }
  0xa7   : > { %1824 = vmatpush3.bf16.msra.mxu0 %v2028_v29 }
  0xa8   : > { %1825 = vmatprep.subr.bf16.mxu0 %v2031_v32 }
  0xa9   : > { %1848 = vmatpush3.bf16.msra.mxu1 %v2034_v25 }
  0xab   : > { %1826 = vmatpush3.bf16.msra.mxu0 %v2032_v44 }
  0xac   : > { %1304 = vmatmul.mubr.bf16.vlgmr.msra.gmra.mxu1 %v1164_v45  ;;  %1855 = vmatprep.subr.bf16.mxu0 %v2035_v46 }
  0xae   : > { %1111 = vmatmul.mubr.bf16.vlgmr.msra.gmra.mxu0 %v978_v47 }
  0xaf   : > { %1856 = vmatpush3.bf16.msra.mxu0 %v2036_v48  ;;  %1484 = vmatprep.mubr.bf16.mxu0 %v1353_v56 }
  0xb0   : > { %1857 = vmatprep.subr.bf16.mxu0 %v2037_v49 }
  0xb3   : > { %1858 = vmatpush3.bf16.msra.mxu0 %v2038_v50 }
  0xb4   : > { %1859 = vmatprep.subr.bf16.mxu0 %v2039_v52 }
  0xb7   : > { %1860 = vmatpush3.bf16.msra.mxu0 %v2040_v55 }
  0xb8   : > { %1861 = vmatprep.subr.bf16.mxu0 %v2041_v57 }
  0xbb   : > { %1862 = vmatpush3.bf16.msra.mxu0 %v2042_v58 }
  0xbc   : > { %1863 = vmatprep.subr.bf16.mxu0 %v2043_v59 }
  0xbf   : > { %1864 = vmatpush3.bf16.msra.mxu0 %v2044_v60 }
  0xc0   : > { %1865 = vmatprep.subr.bf16.mxu0 %v2045_v61 }
  0xc3   : > { %1866 = vmatpush3.bf16.msra.mxu0 %v2046_v62 }
  0xc4   : > { %1867 = vmatprep.subr.bf16.mxu0 %v2047_v63 }
  0xc7   : > { %1868 = vmatpush3.bf16.msra.mxu0 %v2048_v0 }
  0xc8   : > { %1869 = vmatprep.subr.bf16.mxu0 %v2049_v3 }
  0xcb   : > { %1870 = vmatpush3.bf16.msra.mxu0 %v2050_v5 }
  0xce   : > { %1485 = vmatmul.mubr.bf16.vlgmr.msra.gmra.mxu0 %v1352_v6 }
 0x12c   : > { %v1761_v7 = vpop.f32.mrf.mxu1 }
 0x12e   : > { %v1762_v8 = vpop.f32.mrf.mxu1  ;;  %v1739_v11 = vpop.f32.mrf.mxu0 }
 0x12f   : > { %v1763_v9 = vadd.f32 %v1762_v8, %v1761_v7 }
 0x130   : > { %v1764_v10 = vpop.f32.mrf.mxu1  ;;  %v1740_v13 = vpop.f32.mrf.mxu0 }
 0x131   : > { %v1741_v14 = vadd.f32 %v1740_v13, %v1739_v11 }
 0x132   : > { %v1765_v12 = vpop.f32.mrf.mxu1  ;;  %v1742_v15 = vpop.f32.mrf.mxu0 }
 0x133   : > { %v559_v16 = vadd.f32 %v1763_v9, %v1741_v14 }
 0x134   : > { %v1743_v17 = vpop.f32.mrf.mxu0 }
 0x14c   : > { %v1805_v18 = vpop.f32.mrf.mxu1 }
 0x14e   : > { %v1806_v19 = vpop.f32.mrf.mxu1  ;;  %v1783_v22 = vpop.f32.mrf.mxu0 }
 0x14f   : > { %v1807_v20 = vadd.f32 %v1806_v19, %v1805_v18 }
 0x150   : > { %v1808_v21 = vpop.f32.mrf.mxu1  ;;  %v1784_v24 = vpop.f32.mrf.mxu0 }
 0x151   : > { %v1785_v25 = vadd.f32 %v1784_v24, %v1783_v22 }
 0x152   : > { %v1809_v23 = vpop.f32.mrf.mxu1  ;;  %v1786_v26 = vpop.f32.mrf.mxu0 }
 0x153   : > { %v744_v27 = vadd.f32 %v1785_v25, %v559_v16 }
 0x154   : > { %v1787_v28 = vpop.f32.mrf.mxu0 }
 0x155   : > { %v937_v29 = vadd.f32 %v1807_v20, %v744_v27 }
 0x16c   : > { %v1849_v30 = vpop.f32.mrf.mxu1 }
 0x16e   : > { %v1850_v31 = vpop.f32.mrf.mxu1  ;;  %v1827_v33 = vpop.f32.mrf.mxu0 }
 0x16f   : > { %v1851_v40 = vadd.f32 %v1850_v31, %v1849_v30 }
 0x170   : > { %v1852_v32 = vpop.f32.mrf.mxu1  ;;  %v1828_v35 = vpop.f32.mrf.mxu0 }
 0x171   : > { %v1829_v38 = vadd.f32 %v1828_v35, %v1827_v33 }
 0x172   : > { %v1853_v34 = vpop.f32.mrf.mxu1  ;;  %v1830_v36 = vpop.f32.mrf.mxu0 }
 0x173   : > { %v1118_v39 = vadd.f32 %v1829_v38, %v937_v29 }
 0x174   : > { %v1831_v37 = vpop.f32.mrf.mxu0 }
 0x175   : > { %v1311_v43 = vadd.f32 %v1851_v40, %v1118_v39 }
 0x18e   : > { %v1871_v41 = vpop.f32.mrf.mxu0 }
 0x190   : > { %v1872_v42 = vpop.f32.mrf.mxu0 }
 0x191   : > { %v1873_v44 = vadd.f32 %v1872_v42, %v1871_v41 }
 0x192   : > { %v1874_v45 = vpop.f32.mrf.mxu0 }
 0x193   : > { %v1492_v46 = vadd.f32 %v1873_v44, %v1311_v43 }
 0x194   : > { %v1875_v47 = vpop.f32.mrf.mxu0 }
 0x195   : > { %v1717_v48 = vmul.f32 -1.442695, %v1492_v46 }
 0x197   : > { %2051 = vpow2.f32 %v1717_v48 }
 0x1a4   : > { %v2052_v49 = vpop.eup %2051 }
 0x1a5   : > { %v1496_v50 = vadd.f32 1.0, %v2052_v49 }
 0x1a7   : > { %2053 = vrcp.f32 %v1496_v50 }
 0x1b4   : > { %v2054_v51 = vpop.eup %2053 }
 0x1b5   : > { %1499 = vst [vmem:[%s176_s8] sm:$0xff] %v2054_v51 }
 0x1b6   : > { %2122 = shalt.err (!%p2119_p0)
}
 0x1b7   : > { %s2123_s4 = scalar_lea.hbm %s2341_s25, 128  ;;  %s2127_s7 = scalar_lea.hbm %s2380_s2, 256 }
 0x1b8   : > { %p2124_p5 = scmp.ne.s32.totalorder %s2341_s25, %s2123_s4  ;;  %p2128_p4 = scmp.lt.s32.totalorder %s2341_s25, %s2380_s2 }
 0x1b9   : > { %p2129_p6 = scmp.lt.s32.totalorder %s2127_s7, %s2123_s4 }
 0x1ba   : > { %p2125_p9 = pnand %p2124_p5, %p2396_p11 }
 0x1bb   : > { %p2130_p8 = por %p2129_p6, %p2128_p4 }
 0x1bc   : > { %p2126_p1 = pneg %p2125_p9 }
 0x1be   : > { %p2131_p3 = pnand %p2130_p8, %p2126_p1 }
 0x1c0   : > { %2134 = shalt.err (!%p2131_p3)
}
 0x1c1   : > { %1883 = dma.vmem_to_hbm [thread:$0]  (%p2396_p11), %s1515_s18, 128, %s2341_s25, %s1501_s26  }
 0x1c2 PF: > { %s1526_s23 = sand.u32 1, %s2165_s9   ;;  %p2397_p7 = scmp.ne.s32.totalorder %s2386_s16, 0 }
 0x1c3   : > { %p2398_p12 = scmp.ge.s32.totalorder %s2177_s12, 2  ;;  %s1527_s24 = scalar_lea.sflag [#allocation5], %s1526_s23 }
 0x1c5   : > { %p1894_p10 = pnand %p2398_p12, %p2397_p7 }
 0x1c7   : > { %p1895_p2 = pneg %p1894_p10 }
 0x1c9   : > { %2160 = dma.done.wait (%p1895_p2), %s1527_s24, 128  }
 0x1ca   : > { %2162 = vsyncadd (%p1895_p2), %s1527_s24, 4294967168  ;;  %p16_p13 = scmp.ge.s32.totalorder %s2256_s21, 4   ;;  %s2399_s9 = smov %s2169_s10 }
 0x1cb   : > { %s2400_s10 = smov %s2173_s11  ;;  %s2401_s11 = smov %s2273_s29 }
 0x1cc   : > { %s2402_s12 = smov %s2256_s21  ;;  %18 = sbr.rel (!%p16_p13) target bundleno = 6 (0x6), region = 77 }
 0x1d1   :  { %1532 = vsyncpa [#allocation4], 1 }
 0x1d2   :  { %1534 = vsyncpa [#allocation4 + $0x1], 1 }
 0x1d3   :  { %1535 = vsyncpa [#allocation7], 1 }
 0x1d4   :  { %1536 = vsyncpa [#allocation5], 1 }
 0x1d5   :  { %1538 = vsyncpa [#allocation5 + $0x1], 1 }

</bundles_post_ra>
